<compile_context>
chip_gen: v7x
topology: tpu7x:2x2x1
jax: 0.10.0
libtpu: 0.0.40
codegen_flags: <defaults>
</compile_context>

<pallas_src>
import functools

import jax
import jax.numpy as jnp
from jax.experimental import pallas as pl
from jax.experimental.pallas import tpu as pltpu


def _round_up(n, m):
    return ((n + m - 1) // m) * m


def actor_mlp_kernel(x_ref, w1_ref, b1_ref, w2_ref, b2_ref, w3_ref, b3_ref, out_ref):
    """Fused 3-layer MLP for one batch tile: (Linear+ReLU) x2 -> Linear -> tanh.

    Matmul operands are bf16 (MXU native), accumulation / bias / ReLU / tanh in f32.
    """
    x = x_ref[...]  # (TM, in_dim) bf16

    h1 = jnp.dot(x, w1_ref[...], preferred_element_type=jnp.float32) + b1_ref[...]
    h1 = jnp.maximum(h1, 0.0)

    h2 = jnp.dot(h1.astype(w2_ref.dtype), w2_ref[...],
                 preferred_element_type=jnp.float32) + b2_ref[...]
    h2 = jnp.maximum(h2, 0.0)

    o = jnp.dot(h2.astype(w3_ref.dtype), w3_ref[...],
                preferred_element_type=jnp.float32) + b3_ref[...]
    out_ref[...] = jnp.tanh(o).astype(out_ref.dtype)


@functools.partial(jax.jit, static_argnames=("tm",))
def actor_forward(x, params, *, tm=None):
    """Pallas wrapper. x: (B, input_dim) float32. params: dict of f32 weights/biases."""
    B, in_dim = x.shape
    hidden = params["w1"].shape[1]
    out_dim = params["w3"].shape[1]

    # Lane-dense output: pad the action dimension up to a multiple of 128.
    out_pad = _round_up(max(out_dim, 128), 128)

    # Matmul operands in bf16; biases stay f32.
    w1 = params["w1"].astype(jnp.bfloat16)
    w2 = params["w2"].astype(jnp.bfloat16)
    w3 = jnp.pad(params["w3"], ((0, 0), (0, out_pad - out_dim))).astype(jnp.bfloat16)
    b1 = params["b1"].astype(jnp.float32)
    b2 = params["b2"].astype(jnp.float32)
    b3 = jnp.pad(params["b3"], ((0, 0), (0, out_pad - out_dim))).astype(jnp.float32)

    # Batch tile: as large as reasonable (well within VMEM on v5e/v6e/v7x),
    # multiple of 8 sublanes.
    if tm is None:
        tm = min(512, _round_up(B, 8))
    padded_B = _round_up(B, tm)

    x_p = x
    if padded_B != B:
        x_p = jnp.pad(x, ((0, padded_B - B), (0, 0)))
    x_p = x_p.astype(jnp.bfloat16)

    grid = (pl.cdiv(padded_B, tm),)

    # x / out streamed per-tile; weights & biases resident (constant index map).
    x_spec = pl.BlockSpec((tm, in_dim), lambda i: (i, 0))
    out_spec = pl.BlockSpec((tm, out_pad), lambda i: (i, 0))
    resident = lambda shape: pl.BlockSpec(shape, lambda i: (0, 0))

    flops = 2 * padded_B * (in_dim * hidden + hidden * hidden + hidden * out_pad)
    bytes_accessed = (
        padded_B * in_dim * 2                      # x (bf16)
        + (in_dim * hidden + hidden * hidden + hidden * out_pad) * 2  # weights (bf16)
        + (2 * hidden + out_pad) * 4               # biases (f32)
        + padded_B * out_pad * 4                   # output (f32)
    )

    out = pl.pallas_call(
        actor_mlp_kernel,
        out_shape=jax.ShapeDtypeStruct((padded_B, out_pad), jnp.float32),
        grid=grid,
        in_specs=[
            x_spec,
            resident(w1.shape), resident(b1.shape),
            resident(w2.shape), resident(b2.shape),
            resident(w3.shape), resident(b3.shape),
        ],
        out_specs=out_spec,
        compiler_params=pltpu.CompilerParams(
            dimension_semantics=("parallel",),
        ),
        cost_estimate=pl.CostEstimate(
            flops=flops,
            transcendentals=padded_B * out_pad,
            bytes_accessed=bytes_accessed,
        ),
    )(x_p, w1, b1, w2, b2, w3, b3)

    return out[:B, :out_dim]


def init_params(key, input_dim, hidden, output_action, init_w=0.003):
    """Deterministic init mirroring the PyTorch module's init_weights():
       - dense_1 / dense_2 weights: fanin_init -> U(-1/sqrt(fanin), 1/sqrt(fanin))
         (fanin = first dim of the (out, in) weight => out_features, per fanin_init default)
       - output weight: U(-init_w, init_w)
       - biases: PyTorch Linear default U(-1/sqrt(in_features), 1/sqrt(in_features))
    """
    ks = jax.random.split(key, 6)

    def uni(k, shape, bound):
        return jax.random.uniform(k, shape, jnp.float32, minval=-bound, maxval=bound)

    # Stored as (in, out) so kernel does x @ W.
    v1 = 1.0 / jnp.sqrt(jnp.float32(hidden))  # fanin_init default: size[0] = out_features
    v2 = 1.0 / jnp.sqrt(jnp.float32(hidden))
    w1 = uni(ks[0], (input_dim, hidden), v1)
    w2 = uni(ks[1], (hidden, hidden), v2)
    w3 = uni(ks[2], (hidden, output_action), init_w)

    b1 = uni(ks[3], (1, hidden), 1.0 / jnp.sqrt(jnp.float32(input_dim)))
    b2 = uni(ks[4], (1, hidden), 1.0 / jnp.sqrt(jnp.float32(hidden)))
    b3 = uni(ks[5], (1, output_action), 1.0 / jnp.sqrt(jnp.float32(hidden)))

    return dict(w1=w1, b1=b1, w2=w2, b2=b2, w3=w3, b3=b3)


def reference_forward(x, p):
    h1 = jnp.maximum(x @ p["w1"] + p["b1"], 0.0)
    h2 = jnp.maximum(h1 @ p["w2"] + p["b2"], 0.0)
    return jnp.tanh(h2 @ p["w3"] + p["b3"])


if __name__ == "__main__":
    # Small shapes consistent with the module: batch=4, input=32, hidden=32, actions=4.
    batch, input_dim, hidden, output_action = 4, 32, 32, 4

    key = jax.random.PRNGKey(0)
    k_x, k_p = jax.random.split(key)
    x = jax.random.normal(k_x, (batch, input_dim), dtype=jnp.float32)
    params = init_params(k_p, input_dim, hidden, output_action)

    out = actor_forward(x, params)
    out = jax.block_until_ready(out)

    ref = reference_forward(x, params)
    assert out.shape == (batch, output_action)
    # bf16 matmul operands -> looser tolerance vs the pure-f32 reference.
    assert jnp.allclose(out, ref, atol=2e-2, rtol=2e-2), "mismatch vs. pure-JAX reference"

    # Also exercise a larger batch to cover the multi-tile / padded path.
    big_B = 1000
    xb = jax.random.normal(jax.random.PRNGKey(1), (big_B, input_dim), dtype=jnp.float32)
    out_b = jax.block_until_ready(actor_forward(xb, params))
    ref_b = reference_forward(xb, params)
    assert out_b.shape == (big_B, output_action)
    assert jnp.allclose(out_b, ref_b, atol=2e-2, rtol=2e-2), "mismatch on large batch"

    print("KERNEL_OK")
</pallas_src>

<mosaic_0001>
module attributes {stable_mosaic.version = 11 : i64} {
  func.func @actor_mlp_kernel(%arg0: i32, %arg1: memref<8x32xbf16, #tpu.memory_space<vmem>>, %arg2: memref<32x32xbf16, #tpu.memory_space<vmem>>, %arg3: memref<1x32xf32, #tpu.memory_space<vmem>>, %arg4: memref<32x32xbf16, #tpu.memory_space<vmem>>, %arg5: memref<1x32xf32, #tpu.memory_space<vmem>>, %arg6: memref<32x128xbf16, #tpu.memory_space<vmem>>, %arg7: memref<1x128xf32, #tpu.memory_space<vmem>>, %arg8: memref<8x128xf32, #tpu.memory_space<vmem>>) attributes {dimension_semantics = [#tpu.dimension_semantics<parallel>], iteration_bounds = array<i64: 1>, scalar_prefetch = 0 : i64, scratch_operands = 0 : i64, tpu.core_type = #tpu.core_type<tc>, window_params = [{transform_indices = @transform_0, window_bounds = array<i64: 8, 32>}, {pipeline_mode = #tpu.pipeline_mode<synchronous>, transform_indices = @transform_1, window_bounds = array<i64: 32, 32>}, {pipeline_mode = #tpu.pipeline_mode<synchronous>, transform_indices = @transform_2, window_bounds = array<i64: 1, 32>}, {pipeline_mode = #tpu.pipeline_mode<synchronous>, transform_indices = @transform_3, window_bounds = array<i64: 32, 32>}, {pipeline_mode = #tpu.pipeline_mode<synchronous>, transform_indices = @transform_4, window_bounds = array<i64: 1, 32>}, {pipeline_mode = #tpu.pipeline_mode<synchronous>, transform_indices = @transform_5, window_bounds = array<i64: 32, 128>}, {pipeline_mode = #tpu.pipeline_mode<synchronous>, transform_indices = @transform_6, window_bounds = array<i64: 1, 128>}, {transform_indices = @transform_7, window_bounds = array<i64: 8, 128>}]} {
    %c0 = arith.constant 0 : index
    %c0_0 = arith.constant 0 : index
    %0 = vector.load %arg1[%c0, %c0_0] : memref<8x32xbf16, #tpu.memory_space<vmem>>, vector<8x32xbf16>
    %c0_1 = arith.constant 0 : index
    %c0_2 = arith.constant 0 : index
    %1 = vector.load %arg2[%c0_1, %c0_2] : memref<32x32xbf16, #tpu.memory_space<vmem>>, vector<32x32xbf16>
    %cst = arith.constant dense<0.000000e+00> : vector<8x32xf32>
    %2 = tpu.matmul %0, %1, %cst {dimension_numbers = #tpu.dot_dimension_numbers<[1], [0], [0], [1], [0, 0, 1, 1], [], []>} : vector<8x32xbf16>, vector<32x32xbf16>, vector<8x32xf32> -> vector<8x32xf32>
    %c0_3 = arith.constant 0 : index
    %c0_4 = arith.constant 0 : index
    %3 = vector.load %arg3[%c0_3, %c0_4] : memref<1x32xf32, #tpu.memory_space<vmem>>, vector<1x32xf32>
    %4 = vector.broadcast %3 : vector<1x32xf32> to vector<8x32xf32>
    %5 = arith.addf %2, %4 : vector<8x32xf32>
    %cst_5 = arith.constant 0.000000e+00 : f32
    %6 = vector.broadcast %cst_5 : f32 to vector<8x32xf32>
    %7 = arith.maximumf %5, %6 : vector<8x32xf32>
    %8 = arith.truncf %7 : vector<8x32xf32> to vector<8x32xbf16>
    %c0_6 = arith.constant 0 : index
    %c0_7 = arith.constant 0 : index
    %9 = vector.load %arg4[%c0_6, %c0_7] : memref<32x32xbf16, #tpu.memory_space<vmem>>, vector<32x32xbf16>
    %cst_8 = arith.constant dense<0.000000e+00> : vector<8x32xf32>
    %10 = tpu.matmul %8, %9, %cst_8 {dimension_numbers = #tpu.dot_dimension_numbers<[1], [0], [0], [1], [0, 0, 1, 1], [], []>} : vector<8x32xbf16>, vector<32x32xbf16>, vector<8x32xf32> -> vector<8x32xf32>
    %c0_9 = arith.constant 0 : index
    %c0_10 = arith.constant 0 : index
    %11 = vector.load %arg5[%c0_9, %c0_10] : memref<1x32xf32, #tpu.memory_space<vmem>>, vector<1x32xf32>
    %12 = vector.broadcast %11 : vector<1x32xf32> to vector<8x32xf32>
    %13 = arith.addf %10, %12 : vector<8x32xf32>
    %cst_11 = arith.constant 0.000000e+00 : f32
    %14 = vector.broadcast %cst_11 : f32 to vector<8x32xf32>
    %15 = arith.maximumf %13, %14 : vector<8x32xf32>
    %16 = arith.truncf %15 : vector<8x32xf32> to vector<8x32xbf16>
    %c0_12 = arith.constant 0 : index
    %c0_13 = arith.constant 0 : index
    %17 = vector.load %arg6[%c0_12, %c0_13] : memref<32x128xbf16, #tpu.memory_space<vmem>>, vector<32x128xbf16>
    %cst_14 = arith.constant dense<0.000000e+00> : vector<8x128xf32>
    %18 = tpu.matmul %16, %17, %cst_14 {dimension_numbers = #tpu.dot_dimension_numbers<[1], [0], [0], [1], [0, 0, 1, 1], [], []>} : vector<8x32xbf16>, vector<32x128xbf16>, vector<8x128xf32> -> vector<8x128xf32>
    %c0_15 = arith.constant 0 : index
    %c0_16 = arith.constant 0 : index
    %19 = vector.load %arg7[%c0_15, %c0_16] : memref<1x128xf32, #tpu.memory_space<vmem>>, vector<1x128xf32>
    %20 = vector.broadcast %19 : vector<1x128xf32> to vector<8x128xf32>
    %21 = arith.addf %18, %20 : vector<8x128xf32>
    %22 = math.tanh %21 : vector<8x128xf32>
    %c0_17 = arith.constant 0 : index
    %c0_18 = arith.constant 0 : index
    %23 = vector.load %arg8[%c0_17, %c0_18] : memref<8x128xf32, #tpu.memory_space<vmem>>, vector<8x128xf32>
    tpu.vector_store %arg8[%c0_17, %c0_18], %22 {strides = array<i32>} : memref<8x128xf32, #tpu.memory_space<vmem>>, vector<8x128xf32>,
    return
  }
  func.func @transform_0(%arg0: i32) -> (i32, i32) {
    %c0_i32 = arith.constant 0 : i32
    %c0_i32_0 = arith.constant 0 : i32
    return %arg0, %c0_i32 : i32, i32
  }
  func.func @transform_1(%arg0: i32) -> (i32, i32) {
    %c0_i32 = arith.constant 0 : i32
    %c0_i32_0 = arith.constant 0 : i32
    %c0_i32_1 = arith.constant 0 : i32
    return %c0_i32, %c0_i32_0 : i32, i32
  }
  func.func @transform_2(%arg0: i32) -> (i32, i32) {
    %c0_i32 = arith.constant 0 : i32
    %c0_i32_0 = arith.constant 0 : i32
    %c0_i32_1 = arith.constant 0 : i32
    return %c0_i32, %c0_i32_0 : i32, i32
  }
  func.func @transform_3(%arg0: i32) -> (i32, i32) {
    %c0_i32 = arith.constant 0 : i32
    %c0_i32_0 = arith.constant 0 : i32
    %c0_i32_1 = arith.constant 0 : i32
    return %c0_i32, %c0_i32_0 : i32, i32
  }
  func.func @transform_4(%arg0: i32) -> (i32, i32) {
    %c0_i32 = arith.constant 0 : i32
    %c0_i32_0 = arith.constant 0 : i32
    %c0_i32_1 = arith.constant 0 : i32
    return %c0_i32, %c0_i32_0 : i32, i32
  }
  func.func @transform_5(%arg0: i32) -> (i32, i32) {
    %c0_i32 = arith.constant 0 : i32
    %c0_i32_0 = arith.constant 0 : i32
    %c0_i32_1 = arith.constant 0 : i32
    return %c0_i32, %c0_i32_0 : i32, i32
  }
  func.func @transform_6(%arg0: i32) -> (i32, i32) {
    %c0_i32 = arith.constant 0 : i32
    %c0_i32_0 = arith.constant 0 : i32
    %c0_i32_1 = arith.constant 0 : i32
    return %c0_i32, %c0_i32_0 : i32, i32
  }
  func.func @transform_7(%arg0: i32) -> (i32, i32) {
    %c0_i32 = arith.constant 0 : i32
    %c0_i32_0 = arith.constant 0 : i32
    return %arg0, %c0_i32 : i32, i32
  }
}

</mosaic_0001>

<bundles_post_ra>
// kernel: actor_forward.1
= control target key start
LH: loop header
LB: loop body
LE: loop exit
PB: predicated region body
PF: predicated region fallthrough
CT: control target
= control target key end

     0   :  { %v292_v0 = vmov 0.0   ;;  %vm293_vm0 = vmmov 0   ;;  %vm51_vm1 = vcmask 261120   ;;  %s370_s1 = inlined_call_operand.vmem [shape: bf16[32,32], index: 1, kind: input, shape index: {}]   ;;  %s371_s0 = inlined_call_operand.vmem [shape: bf16[8,32], index: 0, kind: input, shape index: {}]   ;;  %s372_s3 = inlined_call_operand.vmem [shape: bf16[32,32], index: 3, kind: input, shape index: {}]   ;;  %s373_s5 = inlined_call_operand.vmem [shape: bf16[32,128], index: 5, kind: input, shape index: {}]   ;;  %s374_s2 = inlined_call_operand.vmem [shape: f32[1,32], index: 2, kind: input, shape index: {}]   ;;  %s375_s4 = inlined_call_operand.vmem [shape: f32[1,32], index: 4, kind: input, shape index: {}]   ;;  %s376_s6 = inlined_call_operand.vmem [shape: f32[1,128], index: 6, kind: input, shape index: {}]   ;;  %s377_s7 = inlined_call_operand.vmem [shape: f32[8,128], index: 7, kind: output, shape index: {}]  }
   0x1   :  { %258 = vmatprep.subr.bf16.mxu0 %v292_v0  ;;  %v284_v1 = vld [vmem:[%s370_s1] sm:$0xff]   ;;  %262 = vmatprep.mubr.msk.bf16.mxu0 %vm293_vm0, %v292_v0  ;;  %v285_v2 = vld [vmem:[%s370_s1 + $0x8] sm:$0xff]  }
   0x2   :  { %266 = vmatprep.subr.bf16.mxu1 %v292_v0  ;;  %270 = vmatprep.mubr.msk.bf16.mxu1 %vm293_vm0, %v292_v0  ;;  %v27_v3 = vld [vmem:[%s371_s0] sm:$0xf]  ;;  %v287_v5 = vld [vmem:[%s372_s3 + $0x8] sm:$0xff]  }
   0x3   :  { %259 = vmatpush3.bf16.msra.mxu0 %v284_v1  ;;  %v286_v4 = vld [vmem:[%s372_s3] sm:$0xff]   ;;  %v289_v15 = vld [vmem:[%s373_s5 + $0x8] sm:$0xff]  }
   0x4   :  { %260 = vmatprep.subr.bf16.mxu0 %v292_v0  ;;  %267 = vmatpush3.bf16.msra.mxu1 %v286_v4  ;;  %v288_v6 = vld [vmem:[%s373_s5] sm:$0xff]  }
   0x5   :  { %268 = vmatprep.subr.bf16.mxu1 %v292_v0  ;;  %v237_v7 = vld [vmem:[%s374_s2] ss:$0 sm:$0xff] }
   0x6   :  { %v241_v16 = vld [vmem:[%s375_s4] ss:$0 sm:$0xff] }
   0x7   :  { %261 = vmatpush3.bf16.msra.mxu0 %v285_v2  ;;  %v245_v24 = vld [vmem:[%s376_s6] ss:$0 sm:$0xff] }
   0x8   :  { %274 = vmatprep.subr.bf16.mxu0 %v292_v0  ;;  %269 = vmatpush3.bf16.msra.mxu1 %v287_v5 }
   0xa   :  { %263 = vmatmul.mubr.msk.bf16.vlgmr.msra.gmra.mrb[0].mxu0 %vm51_vm1, %v27_v3 }
   0xb   :  { %278 = vmatprep.mubr.msk.bf16.mxu0 %vm293_vm0, %v292_v0  ;;  %275 = vmatpush3.bf16.msra.mxu0 %v288_v6 }
   0xc   :  { %276 = vmatprep.subr.bf16.mxu0 %v292_v0 }
   0xf   :  { %277 = vmatpush3.bf16.msra.mxu0 %v289_v15 }
  0xdd   :  { %v89_v8 = vpop.f32.mrb[0].mxu0 }
  0xde   :  { %v90_v9 = vadd.f32 %v237_v7, %v89_v8  ;;  %v264_v10 = vpop.f32.mrb[1].mxu0 }
  0xdf   :  { %v92_v11 = vpop.f32.mrb[2].mxu0 }
  0xe0   :  { %v95_v12 = vmax.f32 %v90_v9, 0.0  ;;  %v265_v13 = vpop.f32.mrb[3].mxu0 }
  0xe2   :  { %v96_v14 = vpack.c.bf16 %v95_v12, %v95_v12 }
  0xe4   :  { %271 = vmatmul.mubr.msk.bf16.vlgmr.msra.gmra.mrb[0].mxu1 %vm51_vm1, %v96_v14 }
 0x1b7   :  { %v157_v17 = vpop.f32.mrb[0].mxu1 }
 0x1b8   :  { %v158_v18 = vadd.f32 %v241_v16, %v157_v17  ;;  %v272_v19 = vpop.f32.mrb[1].mxu1 }
 0x1b9   :  { %v160_v20 = vpop.f32.mrb[2].mxu1 }
 0x1ba   :  { %v163_v21 = vmax.f32 %v158_v18, 0.0  ;;  %v273_v22 = vpop.f32.mrb[3].mxu1 }
 0x1bc   :  { %v164_v23 = vpack.c.bf16 %v163_v21, %v163_v21 }
 0x1be   :  { %279 = vmatmul.mubr.msk.bf16.vlgmr.msra.gmra.mrb[4].mxu0 %vm51_vm1, %v164_v23 }
 0x291   :  { %v225_v25 = vpop.f32.mrb[4].mxu0 }
 0x292   :  { %v226_v26 = vadd.f32 %v245_v24, %v225_v25  ;;  %v280_v27 = vpop.f32.mrb[5].mxu0 }
 0x293   :  { %v228_v28 = vpop.f32.mrb[6].mxu0 }
 0x294   :  { %290 = vtanh.f32 %v226_v26  ;;  %v281_v29 = vpop.f32.mrb[7].mxu0 }
 0x29e   :  { %v291_v30 = vpop.eup %290 }
 0x29f   :  { %232 = vst [vmem:[%s377_s7] sm:$0xff] %v291_v30 }

</bundles_post_ra>
